<compile_context>
chip_gen: v6e
topology: v6e:2x2x1
jax: 0.10.0
libtpu: 0.0.40
codegen_flags: <defaults>
</compile_context>

<pallas_src>
import numpy as np

import jax
import jax.numpy as jnp
from jax.experimental import pallas as pl
from jax.experimental.pallas import tpu as pltpu


# --------------------------------------------------------------------------- #
# Pool-matrix construction (wrapper-side constants)
# --------------------------------------------------------------------------- #
def _fold_pool_matrix(p_in, w_in, dtype):
    """Lane-pooling matrix for the folded layout.

    A slab row holds `p_in` image sub-rows of width `w_in` side by side along
    lanes.  Right-multiplying by the returned (p_in*w_in, (p_in//2)*(w_in//2))
    matrix performs the full 2x2 average pool: output sub-row j, column m is
    0.25 * (x[2j, 2m] + x[2j, 2m+1] + x[2j+1, 2m] + x[2j+1, 2m+1]).
    """
    p_out, w_out = p_in // 2, w_in // 2
    j = np.repeat(np.arange(p_out), w_out)          # output sub-row per column
    m = np.tile(np.arange(w_out), p_out)            # output col within sub-row
    cols = j * w_out + m
    b = np.zeros((p_in * w_in, p_out * w_out), dtype=np.float32)
    for dr in (0, 1):
        for dc in (0, 1):
            rows = (2 * j + dr) * w_in + 2 * m + dc
            b[rows, cols] = 0.25
    return jnp.asarray(b, dtype=dtype)


# --------------------------------------------------------------------------- #
# Tiling heuristics
# --------------------------------------------------------------------------- #
def _vmem_capacity_bytes():
    """Per-TensorCore VMEM capacity; conservative (v7x) fallback off-TPU."""
    try:
        return int(pltpu.get_tpu_info().vmem_capacity_bytes)
    except Exception:
        return 64 << 20


def _choose_fold(nch, w, itemsize):
    """Image rows folded side-by-side along the lane axis (multiple of 4).

    Must divide N*C*H (H % 4 == 0 guarantees 4 always works).  Capped so the
    dense block-diagonal pool matrix (~p*W/2 MXU FLOPs per input element)
    keeps the kernel HBM-bound on every generation (v5e f32 is the tightest
    roofline); prefers leaving >=64 slab rows so the grid can be pipelined.
    """
    cap_lanes = 1024 if itemsize <= 2 else 512
    p_max = min(nch, max(4, (cap_lanes // max(1, w)) // 4 * 4))
    cands = [p for p in range(4, p_max + 1, 4) if nch % p == 0]
    if not cands:
        # TODO(synk): for very large W (>~512 f32 / ~1K bf16) a two-step
        # roll+add lane pool would avoid MXU-bound behaviour on v5e.
        return 4
    big_grid = [p for p in cands if nch // p >= 64]
    return max(big_grid) if big_grid else max(cands)


def _choose_block_rows(m, row_bytes, itemsize, target_bytes):
    """Slab rows per grid step.

    Prefers a sublane-aligned divisor of m (16 rows for 2-byte dtypes, else 8)
    whose input tile is <= target_bytes while leaving >= 8 grid steps
    (>= 4 per TensorCore on v7x).  Never falls back to one full-array block
    for large inputs; ragged edge blocks are used instead.
    """
    min_steps = 8
    for align in ((16, 8) if itemsize < 4 else (8,)):
        divs = [d for d in range(align, m + 1, align) if m % d == 0]
        if not divs:
            continue
        fits = [d for d in divs if d * row_bytes <= target_bytes] or [divs[0]]
        pipelined = [d for d in fits if m // d >= min_steps]
        return max(pipelined) if pipelined else max(fits)
    if m <= 8 or m * row_bytes <= target_bytes:
        return m                                    # tiny problem: one block
    # No aligned divisor, large slab: tile anyway (last block is ragged/masked).
    return max(8, min(m // min_steps, target_bytes // row_bytes) // 8 * 8)


# --------------------------------------------------------------------------- #
# Kernel
# --------------------------------------------------------------------------- #
def _downsampler_kernel(x_ref, b1_ref, b2_ref, f1_ref, f2_ref):
    # Stage 1: one MXU matmul does the whole 2x2 average pool (row pairs sit
    # side by side along lanes thanks to the wrapper-side fold).
    f1 = jnp.dot(x_ref[...], b1_ref[...], preferred_element_type=jnp.float32)
    f1_q = f1.astype(f1_ref.dtype)        # exactly what the module hands to pool #2
    f1_ref[...] = f1_q
    # Stage 2: chained from the in-register f1_q (no VMEM round trip, so the
    # f1 writeback overlaps stage-2 compute); again a single lane matmul.
    f2 = jnp.dot(f1_q, b2_ref[...], preferred_element_type=jnp.float32)
    f2_ref[...] = f2.astype(f2_ref.dtype)


# --------------------------------------------------------------------------- #
# Wrapper
# --------------------------------------------------------------------------- #
def downsampler(x):
    """Pallas equivalent of DownSampler.forward(x) for NCHW input x."""
    n, c, h, w = x.shape
    assert h % 4 == 0 and w % 4 == 0, "H and W must be divisible by 4"
    assert jnp.issubdtype(x.dtype, jnp.floating), "floating-point input expected"

    dtype = x.dtype
    isz = jnp.dtype(dtype).itemsize
    nch = n * c * h

    # Lane fold: p image rows per slab row.
    p = _choose_fold(nch, w, isz)
    m = nch // p
    lanes_in = p * w
    lanes_f1 = p * w // 4
    lanes_f2 = p * w // 16

    # Pool matrices in the input dtype (0.25 is exact in bf16/f32); all the
    # pooling arithmetic runs on the MXU with f32 accumulation.
    b1 = _fold_pool_matrix(p, w, dtype)             # (p*W,   p*W/4)
    b2 = _fold_pool_matrix(p // 2, w // 2, dtype)   # (p*W/4, p*W/16)

    x2d = x.reshape(m, lanes_in)                    # free, contiguous reshape

    # Generation-aware tiling / VMEM budget.
    cap = _vmem_capacity_bytes()
    tile_target = (8 << 20) if cap >= (100 << 20) else (4 << 20)   # v5e/v6e vs v7x
    mb = _choose_block_rows(m, lanes_in * isz, isz, tile_target)
    grid = (pl.cdiv(m, mb),)

    f1_shape = jax.ShapeDtypeStruct((m, lanes_f1), dtype)
    f2_shape = jax.ShapeDtypeStruct((m, lanes_f2), dtype)

    # Advisory cost estimate (kernel is HBM-bound by design).
    flops = 2 * m * lanes_in * lanes_f1 + 2 * m * lanes_f1 * lanes_f2
    bytes_accessed = m * (lanes_in + lanes_f1 + lanes_f2) * isz
    cost = pl.CostEstimate(flops=flops, transcendentals=0,
                           bytes_accessed=bytes_accessed)

    # VMEM: double-buffered in/out tiles + resident pool matrices + slack,
    # clamped below the per-TensorCore capacity (64 MiB on v7x) with headroom.
    blk_bytes = mb * (lanes_in + lanes_f1 + lanes_f2) * isz
    const_bytes = (lanes_in * lanes_f1 + lanes_f1 * lanes_f2) * isz
    needed = 2 * blk_bytes + 2 * const_bytes + (2 << 20)
    usable = max(16 << 20, cap - (32 << 20))
    vmem_limit = int(min(usable, max(16 << 20, needed)))

    f1_flat, f2_flat = pl.pallas_call(
        _downsampler_kernel,
        out_shape=(f1_shape, f2_shape),
        grid_spec=pltpu.PrefetchScalarGridSpec(
            num_scalar_prefetch=0,
            grid=grid,
            in_specs=[
                pl.BlockSpec((mb, lanes_in), lambda i: (i, 0)),
                pl.BlockSpec((lanes_in, lanes_f1), lambda i: (0, 0)),
                pl.BlockSpec((lanes_f1, lanes_f2), lambda i: (0, 0)),
            ],
            out_specs=[
                pl.BlockSpec((mb, lanes_f1), lambda i: (i, 0)),
                pl.BlockSpec((mb, lanes_f2), lambda i: (i, 0)),
            ],
        ),
        compiler_params=pltpu.CompilerParams(
            dimension_semantics=("parallel",),
            vmem_limit_bytes=vmem_limit,
        ),
        cost_estimate=cost,
    )(x2d, b1, b2)

    f1 = f1_flat.reshape(n, c, h // 2, w // 2)
    f2 = f2_flat.reshape(n, c, h // 4, w // 4)
    return f1, f2


# --------------------------------------------------------------------------- #
# Reference + self-test
# --------------------------------------------------------------------------- #
def _avg_pool2x2_ref(x):
    n, c, h, w = x.shape
    return x.reshape(n, c, h // 2, 2, w // 2, 2).mean(axis=(3, 5))


def _check(x, atol, rtol):
    f1, f2 = downsampler(x)
    f1 = jax.block_until_ready(f1)
    f2 = jax.block_until_ready(f2)
    xf = x.astype(jnp.float32)
    f1_ref = _avg_pool2x2_ref(xf)
    f2_ref = _avg_pool2x2_ref(f1_ref)
    n, c, h, w = x.shape
    assert f1.shape == (n, c, h // 2, w // 2)
    assert f2.shape == (n, c, h // 4, w // 4)
    assert jnp.allclose(f1.astype(jnp.float32), f1_ref, atol=atol, rtol=rtol)
    assert jnp.allclose(f2.astype(jnp.float32), f2_ref, atol=atol, rtol=rtol)


if __name__ == "__main__":
    key = jax.random.PRNGKey(0)
    k1, k2, k3 = jax.random.split(key, 3)

    # Primary shape from the module spec (small, single-block path).
    x = jax.random.normal(k1, (2, 4, 16, 16), dtype=jnp.float32)
    _check(x, atol=1e-5, rtol=1e-5)

    # Larger f32 case exercising the multi-step pipelined grid.
    x_big = jax.random.normal(k2, (4, 8, 64, 64), dtype=jnp.float32)
    _check(x_big, atol=1e-5, rtol=1e-5)

    # bf16 case (MXU bf16 path, chained f1 in bf16).
    x_bf16 = jax.random.normal(k3, (2, 8, 32, 32), dtype=jnp.bfloat16)
    _check(x_bf16, atol=3e-2, rtol=3e-2)

    print("KERNEL_OK")
</pallas_src>

<mosaic_0001>
module attributes {stable_mosaic.version = 11 : i64} {
  func.func @_downsampler_kernel(%arg0: i32, %arg1: memref<4x512xf32, #tpu.memory_space<vmem>>, %arg2: memref<512x128xf32, #tpu.memory_space<vmem>>, %arg3: memref<128x32xf32, #tpu.memory_space<vmem>>, %arg4: memref<4x128xf32, #tpu.memory_space<vmem>>, %arg5: memref<4x32xf32, #tpu.memory_space<vmem>>) attributes {dimension_semantics = [#tpu.dimension_semantics<parallel>], iteration_bounds = array<i64: 1>, scalar_prefetch = 0 : i64, scratch_operands = 0 : i64, tpu.core_type = #tpu.core_type<tc>, window_params = [{transform_indices = @transform_0, window_bounds = array<i64: 4, 512>}, {pipeline_mode = #tpu.pipeline_mode<synchronous>, transform_indices = @transform_1, window_bounds = array<i64: 512, 128>}, {pipeline_mode = #tpu.pipeline_mode<synchronous>, transform_indices = @transform_2, window_bounds = array<i64: 128, 32>}, {transform_indices = @transform_3, window_bounds = array<i64: 4, 128>}, {transform_indices = @transform_4, window_bounds = array<i64: 4, 32>}]} {
    %c0 = arith.constant 0 : index
    %c0_0 = arith.constant 0 : index
    %0 = vector.load %arg1[%c0, %c0_0] : memref<4x512xf32, #tpu.memory_space<vmem>>, vector<4x512xf32>
    %c0_1 = arith.constant 0 : index
    %c0_2 = arith.constant 0 : index
    %1 = vector.load %arg2[%c0_1, %c0_2] : memref<512x128xf32, #tpu.memory_space<vmem>>, vector<512x128xf32>
    %cst = arith.constant dense<0.000000e+00> : vector<4x128xf32>
    %2 = tpu.matmul %0, %1, %cst {dimension_numbers = #tpu.dot_dimension_numbers<[1], [0], [0], [1], [0, 0, 1, 1], [], []>} : vector<4x512xf32>, vector<512x128xf32>, vector<4x128xf32> -> vector<4x128xf32>
    %c0_3 = arith.constant 0 : index
    %c0_4 = arith.constant 0 : index
    %3 = vector.load %arg4[%c0_3, %c0_4] : memref<4x128xf32, #tpu.memory_space<vmem>>, vector<4x128xf32>
    tpu.vector_store %arg4[%c0_3, %c0_4], %2 {strides = array<i32>} : memref<4x128xf32, #tpu.memory_space<vmem>>, vector<4x128xf32>,
    %c0_5 = arith.constant 0 : index
    %c0_6 = arith.constant 0 : index
    %4 = vector.load %arg3[%c0_5, %c0_6] : memref<128x32xf32, #tpu.memory_space<vmem>>, vector<128x32xf32>
    %cst_7 = arith.constant dense<0.000000e+00> : vector<4x32xf32>
    %5 = tpu.matmul %2, %4, %cst_7 {dimension_numbers = #tpu.dot_dimension_numbers<[1], [0], [0], [1], [0, 0, 1, 1], [], []>} : vector<4x128xf32>, vector<128x32xf32>, vector<4x32xf32> -> vector<4x32xf32>
    %c0_8 = arith.constant 0 : index
    %c0_9 = arith.constant 0 : index
    %6 = vector.load %arg5[%c0_8, %c0_9] : memref<4x32xf32, #tpu.memory_space<vmem>>, vector<4x32xf32>
    tpu.vector_store %arg5[%c0_8, %c0_9], %5 {strides = array<i32>} : memref<4x32xf32, #tpu.memory_space<vmem>>, vector<4x32xf32>,
    return
  }
  func.func @transform_0(%arg0: i32) -> (i32, i32) {
    %c0_i32 = arith.constant 0 : i32
    %c0_i32_0 = arith.constant 0 : i32
    return %arg0, %c0_i32 : i32, i32
  }
  func.func @transform_1(%arg0: i32) -> (i32, i32) {
    %c0_i32 = arith.constant 0 : i32
    %c0_i32_0 = arith.constant 0 : i32
    %c0_i32_1 = arith.constant 0 : i32
    return %c0_i32, %c0_i32_0 : i32, i32
  }
  func.func @transform_2(%arg0: i32) -> (i32, i32) {
    %c0_i32 = arith.constant 0 : i32
    %c0_i32_0 = arith.constant 0 : i32
    %c0_i32_1 = arith.constant 0 : i32
    return %c0_i32, %c0_i32_0 : i32, i32
  }
  func.func @transform_3(%arg0: i32) -> (i32, i32) {
    %c0_i32 = arith.constant 0 : i32
    %c0_i32_0 = arith.constant 0 : i32
    return %arg0, %c0_i32 : i32, i32
  }
  func.func @transform_4(%arg0: i32) -> (i32, i32) {
    %c0_i32 = arith.constant 0 : i32
    %c0_i32_0 = arith.constant 0 : i32
    return %arg0, %c0_i32 : i32, i32
  }
}

</mosaic_0001>

<bundles_post_ra>
// kernel: tpu_custom_call.1
= control target key start
LH: loop header
LB: loop body
LE: loop exit
PB: predicated region body
PF: predicated region fallthrough
CT: control target
= control target key end

     0   :  { %10 = vsyncpa [#allocation3], 0  ;;  %s654_s0 = inlined_call_operand.vmem [shape: f32[4,512], index: 0, kind: input, shape index: {}]   ;;  %s655_s1 = inlined_call_operand.hbm [shape: f32[512,128], index: 1, kind: input, shape index: {}]   ;;  %s656_s2 = inlined_call_operand.vmem [shape: f32[128,32], index: 2, kind: input, shape index: {}]   ;;  %s657_s3 = inlined_call_operand.hbm [shape: f32[4,128], index: 3, kind: output, shape index: {0}]   ;;  %s658_s4 = inlined_call_operand.hbm [shape: f32[4,32], index: 4, kind: output, shape index: {1}]  }
   0x1   :  { %11 = vsyncpa [#allocation4], 0 }
   0x2   :  { %12 = vsyncpa [#allocation7], 0  ;;  %s559_s15 = smov [#allocation2]  }
   0x3   :  { %s20_s16 = sshll.u32 %s559_s15, 4  ;;  %s21_s16 = int_to_ptr.vmem [resolvable:$true] %s20_s16 }
   0x4   :  { %s501_s17 = scalar_lea.vmem %s21_s16, 8192  ;;  %p506_p1 = scmp.lt.s32.totalorder %s21_s16, %s21_s16 }
   0x5   :  { %p502_p0 = scmp.ne.s32.totalorder %s21_s16, %s501_s17  ;;  %p507_p2 = scmp.lt.s32.totalorder %s501_s17, %s501_s17 }
   0x7   :  { %p508_p3 = por %p507_p2, %p506_p1 }
   0x9   :  { %p509_p4 = pnand %p508_p3, %p502_p0 }
   0xb   :  { %512 = shalt.err (!%p509_p4)
}
   0xc   :  { %s560_s18 = smov 128   ;;  %s561_s19 = smov 8  }
   0xd   :  { %26 = dma.hbm_to_vmem [thread:$0]  %s655_s1, 8192, %s21_s16, [#allocation3], %s560_s18, %s560_s18, %s561_s19  }
   0xe   :  { %553 = dma.done.wait [#allocation3], 8192  }
   0xf   :  { %554 = vsyncadd [#allocation3], 4294959104  ;;  %v65_v0 = vld [vmem:[#allocation2 + $0xf8] sm:$0xff]  ;;  %v64_v4 = vld [vmem:[#allocation2 + $0xf0] sm:$0xff]  ;;  %vm563_vm0 = vmmov 0   ;;  %s564_s28 = smov [#allocation5]  }
  0x10   :  { %v97_v1 = vld [vmem:[#allocation2 + $0x1f8] sm:$0xff]  ;;  %362 = vmatprep.subr.mxu0 %v65_v0  ;;  %v96_v5 = vld [vmem:[#allocation2 + $0x1f0] sm:$0xff]  ;;  %v63_v8 = vld [vmem:[#allocation2 + $0xe8] sm:$0xff]  ;;  %s339_s29 = sshll.u32 %s564_s28, 4  ;;  %s340_s29 = int_to_ptr.vmem [resolvable:$true] %s339_s29 }
  0x11   :  { %v49_v2 = vld [vmem:[#allocation2 + $0x78] sm:$0xff]  ;;  %397 = vmatprep.subr.mxu1 %v97_v1  ;;  %v48_v6 = vld [vmem:[#allocation2 + $0x70] sm:$0xff]  ;;  %v95_v9 = vld [vmem:[#allocation2 + $0x1e8] sm:$0xff]  ;;  %s513_s30 = scalar_lea.vmem %s340_s29, 64  ;;  %p518_p6 = scmp.lt.s32.totalorder %s340_s29, %s340_s29 }
  0x12   :  { %v81_v3 = vld [vmem:[#allocation2 + $0x178] sm:$0xff]  ;;  %363 = vmatpush3.msra.mxu0 %v49_v2  ;;  %v80_v7 = vld [vmem:[#allocation2 + $0x170] sm:$0xff]  ;;  %v47_v10 = vld [vmem:[#allocation2 + $0x68] sm:$0xff]  ;;  %p514_p5 = scmp.ne.s32.totalorder %s340_s29, %s513_s30  ;;  %p519_p7 = scmp.lt.s32.totalorder %s513_s30, %s513_s30 }
  0x13   :  { %398 = vmatpush3.msra.mxu1 %v81_v3  ;;  %364 = vmatprep.subr.mxu0 %v64_v4  ;;  %v79_v11 = vld [vmem:[#allocation2 + $0x168] sm:$0xff]  ;;  %v62_v12 = vld [vmem:[#allocation2 + $0xe0] sm:$0xff]  ;;  %v61_v16 = vld [vmem:[#allocation2 + $0xd8] sm:$0xff] }
  0x14   :  { %399 = vmatprep.subr.mxu1 %v96_v5  ;;  %365 = vmatpush3.msra.mxu0 %v48_v6  ;;  %v94_v13 = vld [vmem:[#allocation2 + $0x1e0] sm:$0xff]  ;;  %v93_v17 = vld [vmem:[#allocation2 + $0x1d8] sm:$0xff]  ;;  %v60_v20 = vld [vmem:[#allocation2 + $0xd0] sm:$0xff]  ;;  %v562_v5 = vmov 0.0   ;;  %p520_p8 = por %p519_p7, %p518_p6 }
  0x15   :  { %400 = vmatpush3.msra.mxu1 %v80_v7  ;;  %366 = vmatprep.subr.mxu0 %v63_v8  ;;  %v46_v14 = vld [vmem:[#allocation2 + $0x60] sm:$0xff]  ;;  %v45_v18 = vld [vmem:[#allocation2 + $0x58] sm:$0xff]  ;;  %v92_v21 = vld [vmem:[#allocation2 + $0x1d0] sm:$0xff] }
  0x16   :  { %401 = vmatprep.subr.mxu1 %v95_v9  ;;  %v78_v15 = vld [vmem:[#allocation2 + $0x160] sm:$0xff]  ;;  %367 = vmatpush3.msra.mxu0 %v47_v10  ;;  %v77_v19 = vld [vmem:[#allocation2 + $0x158] sm:$0xff]  ;;  %v44_v22 = vld [vmem:[#allocation2 + $0x50] sm:$0xff]  ;;  %p521_p9 = pnand %p520_p8, %p514_p5 }
  0x17   :  { %402 = vmatpush3.msra.mxu1 %v79_v11  ;;  %368 = vmatprep.subr.mxu0 %v62_v12  ;;  %v76_v23 = vld [vmem:[#allocation2 + $0x150] sm:$0xff]  ;;  %v59_v24 = vld [vmem:[#allocation2 + $0xc8] sm:$0xff]  ;;  %v58_v28 = vld [vmem:[#allocation2 + $0xc0] sm:$0xff] }
  0x18   :  { %403 = vmatprep.subr.mxu1 %v94_v13  ;;  %369 = vmatpush3.msra.mxu0 %v46_v14  ;;  %v91_v25 = vld [vmem:[#allocation2 + $0x1c8] sm:$0xff]  ;;  %v90_v29 = vld [vmem:[#allocation2 + $0x1c0] sm:$0xff]  ;;  %v57_v32 = vld [vmem:[#allocation2 + $0xb8] sm:$0xff] }
  0x19   :  { %404 = vmatpush3.msra.mxu1 %v78_v15  ;;  %370 = vmatprep.subr.mxu0 %v61_v16  ;;  %v43_v26 = vld [vmem:[#allocation2 + $0x48] sm:$0xff]  ;;  %v42_v30 = vld [vmem:[#allocation2 + $0x40] sm:$0xff]  ;;  %v89_v33 = vld [vmem:[#allocation2 + $0x1b8] sm:$0xff] }
  0x1a   :  { %405 = vmatprep.subr.mxu1 %v93_v17  ;;  %371 = vmatpush3.msra.mxu0 %v45_v18  ;;  %v75_v27 = vld [vmem:[#allocation2 + $0x148] sm:$0xff]  ;;  %v74_v31 = vld [vmem:[#allocation2 + $0x140] sm:$0xff]  ;;  %v41_v34 = vld [vmem:[#allocation2 + $0x38] sm:$0xff] }
  0x1b   :  { %406 = vmatpush3.msra.mxu1 %v77_v19  ;;  %372 = vmatprep.subr.mxu0 %v60_v20  ;;  %v73_v35 = vld [vmem:[#allocation2 + $0x138] sm:$0xff]  ;;  %v56_v36 = vld [vmem:[#allocation2 + $0xb0] sm:$0xff]  ;;  %v55_v40 = vld [vmem:[#allocation2 + $0xa8] sm:$0xff] }
  0x1c   :  { %407 = vmatprep.subr.mxu1 %v92_v21  ;;  %373 = vmatpush3.msra.mxu0 %v44_v22  ;;  %v88_v37 = vld [vmem:[#allocation2 + $0x1b0] sm:$0xff]  ;;  %v87_v41 = vld [vmem:[#allocation2 + $0x1a8] sm:$0xff]  ;;  %v54_v44 = vld [vmem:[#allocation2 + $0xa0] sm:$0xff] }
  0x1d   :  { %408 = vmatpush3.msra.mxu1 %v76_v23  ;;  %374 = vmatprep.subr.mxu0 %v59_v24  ;;  %v40_v38 = vld [vmem:[#allocation2 + $0x30] sm:$0xff]  ;;  %v39_v42 = vld [vmem:[#allocation2 + $0x28] sm:$0xff]  ;;  %v86_v45 = vld [vmem:[#allocation2 + $0x1a0] sm:$0xff] }
  0x1e   :  { %409 = vmatprep.subr.mxu1 %v91_v25  ;;  %375 = vmatpush3.msra.mxu0 %v43_v26  ;;  %v72_v39 = vld [vmem:[#allocation2 + $0x130] sm:$0xff]  ;;  %v71_v43 = vld [vmem:[#allocation2 + $0x128] sm:$0xff]  ;;  %v38_v46 = vld [vmem:[#allocation2 + $0x20] sm:$0xff] }
  0x1f   :  { %410 = vmatpush3.msra.mxu1 %v75_v27  ;;  %376 = vmatprep.subr.mxu0 %v58_v28  ;;  %v70_v47 = vld [vmem:[#allocation2 + $0x120] sm:$0xff]  ;;  %v53_v48 = vld [vmem:[#allocation2 + $0x98] sm:$0xff]  ;;  %v52_v52 = vld [vmem:[#allocation2 + $0x90] sm:$0xff] }
  0x20   :  { %411 = vmatprep.subr.mxu1 %v90_v29  ;;  %377 = vmatpush3.msra.mxu0 %v42_v30  ;;  %v85_v49 = vld [vmem:[#allocation2 + $0x198] sm:$0xff]  ;;  %v84_v53 = vld [vmem:[#allocation2 + $0x190] sm:$0xff]  ;;  %v32_v56 = vld [vmem:[%s654_s0] sm:$0xff] }
  0x21   :  { %412 = vmatpush3.msra.mxu1 %v74_v31  ;;  %378 = vmatprep.subr.mxu0 %v57_v32  ;;  %v37_v50 = vld [vmem:[#allocation2 + $0x18] sm:$0xff]  ;;  %v36_v54 = vld [vmem:[#allocation2 + $0x10] sm:$0xff]  ;;  %v51_v57 = vld [vmem:[#allocation2 + $0x88] sm:$0xff]  ;;  %v100_v0 = vcombine.high %v32_v56, %v32_v56 }
  0x22   :  { %413 = vmatprep.subr.mxu1 %v89_v33  ;;  %379 = vmatpush3.msra.mxu0 %v41_v34  ;;  %v69_v51 = vld [vmem:[#allocation2 + $0x118] sm:$0xff]  ;;  %v68_v55 = vld [vmem:[#allocation2 + $0x110] sm:$0xff]  ;;  %v83_v58 = vld [vmem:[#allocation2 + $0x188] sm:$0xff] }
  0x23   :  { %414 = vmatpush3.msra.mxu1 %v73_v35  ;;  %380 = vmatprep.subr.mxu0 %v56_v36  ;;  %v33_v59 = vld [vmem:[%s654_s0 + $0x8] sm:$0xff]  ;;  %v50_v62 = vld [vmem:[#allocation2 + $0x80] sm:$0xff]  ;;  %v260_v4 = vld [vmem:[%s656_s2 + $0x78] sm:$0xff] }
  0x24   :  { %415 = vmatprep.subr.mxu1 %v88_v37  ;;  %381 = vmatpush3.msra.mxu0 %v40_v38  ;;  %v35_v60 = vld [vmem:[#allocation2 + $0x8] sm:$0xff]  ;;  %v82_v63 = vld [vmem:[#allocation2 + $0x180] sm:$0xff]  ;;  %v101_v2 = vcombine.high %v33_v59, %v33_v59  ;;  %v259_v6 = vld [vmem:[%s656_s2 + $0x70] sm:$0xff] }
  0x25   :  { %416 = vmatpush3.msra.mxu1 %v72_v39  ;;  %382 = vmatprep.subr.mxu0 %v55_v40  ;;  %v67_v61 = vld [vmem:[#allocation2 + $0x108] sm:$0xff]  ;;  %v34_v1 = vld [vmem:[#allocation2] sm:$0xff]  ;;  %v256_v9 = vld [vmem:[%s656_s2 + $0x58] sm:$0xff] }
  0x26   :  { %417 = vmatprep.subr.mxu1 %v87_v41  ;;  %383 = vmatpush3.msra.mxu0 %v39_v42  ;;  %v66_v3 = vld [vmem:[#allocation2 + $0x100] sm:$0xff]  ;;  %v258_v7 = vld [vmem:[%s656_s2 + $0x68] sm:$0xff]  ;;  %v255_v10 = vld [vmem:[%s656_s2 + $0x50] sm:$0xff] }
  0x27   :  { %418 = vmatpush3.msra.mxu1 %v71_v43  ;;  %384 = vmatprep.subr.mxu0 %v54_v44  ;;  %v257_v8 = vld [vmem:[%s656_s2 + $0x60] sm:$0xff]  ;;  %v254_v11 = vld [vmem:[%s656_s2 + $0x48] sm:$0xff]  ;;  %v252_v13 = vld [vmem:[%s656_s2 + $0x38] sm:$0xff] }
  0x28   :  { %419 = vmatprep.subr.mxu1 %v86_v45  ;;  %385 = vmatpush3.msra.mxu0 %v38_v46  ;;  %v253_v12 = vld [vmem:[%s656_s2 + $0x40] sm:$0xff]  ;;  %v251_v14 = vld [vmem:[%s656_s2 + $0x30] sm:$0xff]  ;;  %v250_v15 = vld [vmem:[%s656_s2 + $0x28] sm:$0xff] }
  0x29   :  { %420 = vmatpush3.msra.mxu1 %v70_v47  ;;  %386 = vmatprep.subr.mxu0 %v53_v48  ;;  %v249_v16 = vld [vmem:[%s656_s2 + $0x20] sm:$0xff]  ;;  %v248_v17 = vld [vmem:[%s656_s2 + $0x18] sm:$0xff]  ;;  %v247_v18 = vld [vmem:[%s656_s2 + $0x10] sm:$0xff] }
  0x2a   :  { %421 = vmatprep.subr.mxu1 %v85_v49  ;;  %387 = vmatpush3.msra.mxu0 %v37_v50  ;;  %v246_v19 = vld [vmem:[%s656_s2 + $0x8] sm:$0xff]  ;;  %v245_v20 = vld [vmem:[%s656_s2] sm:$0xff] }
  0x2b   :  { %422 = vmatpush3.msra.mxu1 %v69_v51  ;;  %388 = vmatprep.subr.mxu0 %v52_v52 }
  0x2c   :  { %423 = vmatprep.subr.mxu1 %v84_v53  ;;  %389 = vmatpush3.msra.mxu0 %v36_v54 }
  0x2d   :  { %424 = vmatpush3.msra.mxu1 %v68_v55  ;;  %390 = vmatprep.subr.mxu0 %v51_v57 }
  0x2e   :  { %425 = vmatprep.subr.mxu1 %v83_v58  ;;  %391 = vmatpush3.msra.mxu0 %v35_v60 }
  0x2f   :  { %426 = vmatpush3.msra.mxu1 %v67_v61  ;;  %392 = vmatprep.subr.mxu0 %v50_v62 }
  0x30   :  { %427 = vmatprep.subr.mxu1 %v82_v63  ;;  %393 = vmatpush3.msra.mxu0 %v34_v1 }
  0x31   :  { %168 = vmatprep.mubr.f32.mxu0 %v100_v0  ;;  %428 = vmatpush3.msra.mxu1 %v66_v3 }
  0x32   :  { %238 = vmatprep.mubr.f32.mxu1 %v101_v2  ;;  %169 = vmatmul.mubr.f32.vlgmr.msra.gmra.mxu0 %v32_v56 }
  0x33   :  { %239 = vmatmul.mubr.f32.vlgmr.msra.gmra.mxu1 %v33_v59  ;;  %449 = vmatprep.subr.mxu0 %v562_v5 }
  0x34   :  { %450 = vmatpush3.msra.mxu0 %v260_v4  ;;  %481 = vmatprep.mubr.msk.f32.mxu0 %vm563_vm0, %v562_v5 }
  0x35   :  { %451 = vmatprep.subr.mxu0 %v562_v5 }
  0x36   :  { %452 = vmatpush3.msra.mxu0 %v259_v6 }
  0x37   :  { %453 = vmatprep.subr.mxu0 %v562_v5 }
  0x38   :  { %454 = vmatpush3.msra.mxu0 %v258_v7 }
  0x39   :  { %455 = vmatprep.subr.mxu0 %v562_v5 }
  0x3a   :  { %456 = vmatpush3.msra.mxu0 %v257_v8 }
  0x3b   :  { %457 = vmatprep.subr.mxu0 %v562_v5 }
  0x3c   :  { %458 = vmatpush3.msra.mxu0 %v256_v9 }
  0x3d   :  { %459 = vmatprep.subr.mxu0 %v562_v5 }
  0x3e   :  { %460 = vmatpush3.msra.mxu0 %v255_v10 }
  0x3f   :  { %461 = vmatprep.subr.mxu0 %v562_v5 }
  0x40   :  { %462 = vmatpush3.msra.mxu0 %v254_v11 }
  0x41   :  { %463 = vmatprep.subr.mxu0 %v562_v5 }
  0x42   :  { %464 = vmatpush3.msra.mxu0 %v253_v12 }
  0x43   :  { %465 = vmatprep.subr.mxu0 %v562_v5 }
  0x44   :  { %466 = vmatpush3.msra.mxu0 %v252_v13 }
  0x45   :  { %467 = vmatprep.subr.mxu0 %v562_v5 }
  0x46   :  { %468 = vmatpush3.msra.mxu0 %v251_v14 }
  0x47   :  { %469 = vmatprep.subr.mxu0 %v562_v5 }
  0x48   :  { %470 = vmatpush3.msra.mxu0 %v250_v15 }
  0x49   :  { %471 = vmatprep.subr.mxu0 %v562_v5 }
  0x4a   :  { %472 = vmatpush3.msra.mxu0 %v249_v16 }
  0x4b   :  { %473 = vmatprep.subr.mxu0 %v562_v5 }
  0x4c   :  { %474 = vmatpush3.msra.mxu0 %v248_v17 }
  0x4d   :  { %475 = vmatprep.subr.mxu0 %v562_v5 }
  0x4e   :  { %476 = vmatpush3.msra.mxu0 %v247_v18 }
  0x4f   :  { %477 = vmatprep.subr.mxu0 %v562_v5 }
  0x50   :  { %478 = vmatpush3.msra.mxu0 %v246_v19 }
  0x51   :  { %479 = vmatprep.subr.mxu0 %v562_v5 }
  0x52   :  { %480 = vmatpush3.msra.mxu0 %v245_v20 }
  0xf2   :  { %v394_v21 = vpop.f32.mrf.mxu0 }
  0xf3   :  { %v429_v22 = vpop.f32.mrf.mxu1 }
  0xf4   :  { %v395_v23 = vpop.f32.mrf.mxu0 }
  0xf5   :  { %v430_v24 = vpop.f32.mrf.mxu1  ;;  %v396_v25 = vadd.f32 %v395_v23, %v394_v21 }
  0xf6   :  { %v431_v26 = vadd.f32 %v430_v24, %v429_v22 }
  0xf8   :  { %v241_v27 = vadd.f32 %v431_v26, %v396_v25 }
  0xfa   :  { %244 = vst [vmem:[#allocation5] sm:$0xf] %v241_v27  ;;  %482 = vmatmul.mubr.f32.vlgmr.msra.gmra.mxu0 %v241_v27 }
  0xfb   :  { %524 = shalt.err (!%p521_p9)
}
  0xfc   :  { %342 = dma.vmem_to_hbm [thread:$0]  %s340_s29, 64, %s657_s3, [#allocation4]   ;;  %vm331_vm1 = vcmask 257024  }
  0xfd   :  { %s565_s6 = smov [#allocation6]  }
  0xfe   :  { %s349_s7 = sshll.u32 %s565_s6, 4  ;;  %s350_s7 = int_to_ptr.vmem [resolvable:$true] %s349_s7 }
  0xff   :  { %s533_s8 = scalar_lea.vmem %s350_s7, 64  ;;  %p538_p11 = scmp.lt.s32.totalorder %s350_s7, %s350_s7 }
 0x100   :  { %p534_p10 = scmp.ne.s32.totalorder %s350_s7, %s533_s8  ;;  %p539_p12 = scmp.lt.s32.totalorder %s533_s8, %s533_s8 }
 0x102   :  { %p540_p13 = por %p539_p12, %p538_p11 }
 0x104   :  { %p541_p0 = pnand %p540_p13, %p534_p10 }
 0x1ba   :  { %v327_v28 = vpop.f32.mrf.mxu0 }
 0x1bb   :  { %332 = vst.msk [vmem:[#allocation6] sm:$0xf] %vm331_vm1, %v327_v28 }
 0x1bc   :  { %v483_v29 = vpop.f32.mrf.mxu0 }
 0x1bd   :  { %544 = shalt.err (!%p541_p0)
}
 0x1be   :  { %352 = dma.vmem_to_hbm [thread:$0]  %s350_s7, 64, %s658_s4, [#allocation7]  }
 0x1bf   :  { %555 = dma.done.wait [#allocation4], 64  }
 0x1c0   :  { %556 = vsyncadd [#allocation4], 4294967232 }
 0x1c1   :  { %557 = dma.done.wait [#allocation7], 64  }
 0x1c2   :  { %558 = vsyncadd [#allocation7], 4294967232 }
 0x1c3   :  { %359 = vsyncpa [#allocation3], 1 }
 0x1c4   :  { %360 = vsyncpa [#allocation4], 1 }
 0x1c5   :  { %361 = vsyncpa [#allocation7], 1 }

</bundles_post_ra>
